<compile_context>
chip_gen: v7x
topology: tpu7x:2x2x1
jax: 0.10.0
libtpu: 0.0.40
codegen_flags: <defaults>
</compile_context>

<pallas_src>
import functools

import numpy as np

import jax
import jax.numpy as jnp
from jax import lax
from jax.experimental import pallas as pl
from jax.experimental.pallas import tpu as pltpu

EPS = 1e-6          # PyTorch module uses InstanceNorm2d(..., eps=1e-06).
KSIZE = 3
PAD = 1             # same padding for kernel=3, dilation=1
TAPS = tuple((dh, dw) for dh in (-1, 0, 1) for dw in (-1, 0, 1))


def _elu(v):
    # ELU(alpha=1): v if v > 0 else exp(v) - 1
    return jnp.where(v > 0, v, jnp.exp(jnp.minimum(v, 0.0)) - 1.0)


def _round_up(x, m):
    return (x + m - 1) // m * m


def _pick_batch_tile(n, cap=8):
    # Largest divisor of n that is <= cap.  Small n -> one fat step (per-step
    # overhead dominates); large n -> >= n/cap steps so each TensorCore still
    # gets a multi-step prefetch/compute/writeback pipeline (v7x).
    bt = min(n, cap)
    while n % bt:
        bt -= 1
    return bt


def _resblock_kernel(x_ref, m_ref, w1_ref, g1_ref, b1_ref, w2_ref, g2_ref,
                     b2_ref, o_ref, *, W, matmul_dtype):
    # x_ref: (BT, Cp, HW); m_ref: (8, 1, HW) f32; w*_ref: (Cp, 9*Cp) matmul_dtype;
    # g/b: (Cp, 1) f32; o_ref: (BT, Cp, HW).
    BT, Cp, HW = x_ref.shape

    x = x_ref[...].astype(jnp.float32)                       # (BT, Cp, HW)

    def conv3x3(inp, w_ref):
        # im2col: 9 lane-rolled (and boundary-masked) copies stacked along the
        # (tile-aligned) sublane axis, then one batched MXU matmul.
        pieces = []
        mi = 0
        for dh, dw in TAPS:
            if dh == 0 and dw == 0:
                pieces.append(inp)                            # center tap: no mask
                continue
            s = dh * W + dw                                   # shifted[p] = inp[p + s]
            shifted = pltpu.roll(inp, shift=(-s) % HW, axis=2)
            pieces.append(shifted * m_ref[mi])                # (1, HW) mask broadcast
            mi += 1
        patches = jnp.concatenate(pieces, axis=1)             # (BT, 9*Cp, HW)
        wb = jnp.broadcast_to(w_ref[...], (BT,) + tuple(w_ref.shape))
        return jnp.einsum("bck,bkp->bcp", wb, patches.astype(matmul_dtype),
                          preferred_element_type=jnp.float32)  # (BT, Cp, HW) f32

    def instance_norm(y, g_ref, b_ref):
        # One-pass per-image, per-channel stats (biased var, like PyTorch IN),
        # fused to y*scale + shift.  Clamp var >= 0 against f32 cancellation.
        inv_n = 1.0 / HW
        mean = jnp.sum(y, axis=2, keepdims=True) * inv_n       # (BT, Cp, 1)
        ex2 = jnp.sum(y * y, axis=2, keepdims=True) * inv_n
        var = jnp.maximum(ex2 - mean * mean, 0.0)
        scale = lax.rsqrt(var + EPS) * g_ref[...]
        shift = b_ref[...] - mean * scale
        return y * scale + shift

    # --- branch: conv1 -> IN1 -> ELU -> dropout(identity in eval) -> conv2 -> IN2 ---
    h = conv3x3(x, w1_ref)
    h = instance_norm(h, g1_ref, b1_ref)
    h = _elu(h)
    # TODO(synk): nn.Dropout(p=0.15) is identity in eval mode; training-mode
    #             stochastic dropout (pltpu.prng_*) intentionally not applied here.
    h = conv3x3(h, w2_ref)
    h = instance_norm(h, g2_ref, b2_ref)

    # --- residual add + final ELU ---
    o_ref[...] = _elu(x + h).astype(o_ref.dtype)


@functools.partial(jax.jit, static_argnames=("matmul_dtype",))
def resblock2d_pallas(x_nchw, w1, g1, b1, w2, g2, b2, *, matmul_dtype=jnp.float32):
    """x_nchw: (N, C, H, W) f32; w1/w2: (3,3,C,C) HWIO; g/b: (C,).

    matmul_dtype=jnp.bfloat16 keeps f32 accumulation but feeds bf16 operands to
    the MXU (recommended on v6e/v7x); default f32 matches PyTorch exactly.
    """
    N, C, H, W = x_nchw.shape
    HW = H * W
    Cp = _round_up(C, 8)                       # sublane-tile aligned channel count
    nine_c = KSIZE * KSIZE * Cp
    BT = _pick_batch_tile(N)

    # Free contiguous reshape + channel zero-pad (padded channels stay 0 end-to-end).
    x = x_nchw.reshape(N, C, HW)
    if Cp != C:
        x = jnp.pad(x, ((0, 0), (0, Cp - C), (0, 0)))

    def to_matrix(w_hwio):
        # HWIO (kh, kw, ci, co) -> (co, kh*kw*ci_pad), matching patch row order
        # (tap-major, channel-minor); padded rows/cols are zero.
        w_t = jnp.transpose(w_hwio, (3, 0, 1, 2))                    # (co, kh, kw, ci)
        w_t = jnp.pad(w_t, ((0, Cp - C), (0, 0), (0, 0), (0, Cp - C)))
        return w_t.reshape(Cp, nine_c).astype(matmul_dtype)

    def pad_vec(v):
        return jnp.pad(v, (0, Cp - C)).reshape(Cp, 1).astype(jnp.float32)

    w1m, w2m = to_matrix(w1), to_matrix(w2)
    g1r, b1r, g2r, b2r = pad_vec(g1), pad_vec(b1), pad_vec(g2), pad_vec(b2)

    # "Same"-padding validity masks for the 8 non-center taps, built once at trace
    # time (compile-time constant) -- no per-step iota/compare work in the kernel.
    pidx = np.arange(HW)
    hi, wi = pidx // W, pidx % W
    mlist = []
    for dh, dw in TAPS:
        if dh == 0 and dw == 0:
            continue
        valid = np.ones(HW, dtype=bool)
        if dh:
            valid &= (hi + dh >= 0) & (hi + dh < H)
        if dw:
            valid &= (wi + dw >= 0) & (wi + dw < W)
        mlist.append(valid)
    masks = jnp.asarray(np.stack(mlist).astype(np.float32).reshape(8, 1, HW))

    kernel = functools.partial(_resblock_kernel, W=W, matmul_dtype=matmul_dtype)

    out = pl.pallas_call(
        kernel,
        out_shape=jax.ShapeDtypeStruct((N, Cp, HW), x_nchw.dtype),
        grid_spec=pltpu.PrefetchScalarGridSpec(
            num_scalar_prefetch=0,
            grid=(N // BT,),
            in_specs=[
                pl.BlockSpec((BT, Cp, HW), lambda n: (n, 0, 0)),
                pl.BlockSpec((8, 1, HW), lambda n: (0, 0, 0)),
                # TODO(synk): on v7x, single-buffer these constant-index operands
                #             (pipeline_mode=pl.Buffered(1)) to halve their VMEM
                #             footprint at production channel counts.
                pl.BlockSpec((Cp, nine_c), lambda n: (0, 0)),
                pl.BlockSpec((Cp, 1), lambda n: (0, 0)),
                pl.BlockSpec((Cp, 1), lambda n: (0, 0)),
                pl.BlockSpec((Cp, nine_c), lambda n: (0, 0)),
                pl.BlockSpec((Cp, 1), lambda n: (0, 0)),
                pl.BlockSpec((Cp, 1), lambda n: (0, 0)),
            ],
            out_specs=pl.BlockSpec((BT, Cp, HW), lambda n: (n, 0, 0)),
        ),
        # Batch tiles are independent -> shard across v7x's two TensorCores;
        # neutral on single-TC v5e/v6e.  Explicit VMEM budget (fits all chips).
        compiler_params=pltpu.CompilerParams(
            dimension_semantics=("parallel",),
            vmem_limit_bytes=32 * 1024 * 1024,
        ),
        # TODO(synk): for production-size (H, W, C) add a spatial row-tile grid
        #             axis with a 1-row halo (grid=(N//BT, H//TH)) so the 9x
        #             im2col expansion fits v7x's 64 MiB VMEM.
    )(x, masks, w1m, g1r, b1r, w2m, g2r, b2r)

    return out[:, :C, :].reshape(N, C, H, W)


# ----------------------------- pure-JAX reference -----------------------------
def _reference(x_nchw, w1, g1, b1, w2, g2, b2):
    def conv(x, w_hwio):
        return lax.conv_general_dilated(
            x, w_hwio, window_strides=(1, 1),
            padding=((PAD, PAD), (PAD, PAD)),
            dimension_numbers=("NCHW", "HWIO", "NCHW"))

    def inorm(y, g, b):
        mean = jnp.mean(y, axis=(2, 3), keepdims=True)
        var = jnp.mean((y - mean) ** 2, axis=(2, 3), keepdims=True)
        y_n = (y - mean) * lax.rsqrt(var + EPS)
        return y_n * g.reshape(1, -1, 1, 1) + b.reshape(1, -1, 1, 1)

    h = conv(x_nchw, w1)
    h = inorm(h, g1, b1)
    h = _elu(h)
    h = conv(h, w2)
    h = inorm(h, g2, b2)
    return _elu(x_nchw + h)


if __name__ == "__main__":
    N, C, H, W = 2, 4, 16, 16
    key = jax.random.PRNGKey(0)
    kx, k1, k2, k3, k4, k5, k6 = jax.random.split(key, 7)

    x = jax.random.normal(kx, (N, C, H, W), jnp.float32)
    # Conv2d weights (no bias), built directly in HWIO = (kh, kw, C_in, C_out).
    w1 = 0.1 * jax.random.normal(k1, (KSIZE, KSIZE, C, C), jnp.float32)
    w2 = 0.1 * jax.random.normal(k2, (KSIZE, KSIZE, C, C), jnp.float32)
    # InstanceNorm2d affine params.
    g1 = 1.0 + 0.05 * jax.random.normal(k3, (C,), jnp.float32)
    b1 = 0.05 * jax.random.normal(k4, (C,), jnp.float32)
    g2 = 1.0 + 0.05 * jax.random.normal(k5, (C,), jnp.float32)
    b2 = 0.05 * jax.random.normal(k6, (C,), jnp.float32)

    ref = _reference(x, w1, g1, b1, w2, g2, b2)

    # Exact-semantics path (f32 MXU operands, matches PyTorch).
    out = jax.block_until_ready(resblock2d_pallas(x, w1, g1, b1, w2, g2, b2))
    assert out.shape == (N, C, H, W)
    assert jnp.allclose(out, ref, rtol=2e-4, atol=2e-4), (
        float(jnp.max(jnp.abs(out - ref))))

    # bf16-operand path (recommended on v6e/v7x MXU); InstanceNorm re-normalizes,
    # so error stays small -- checked with a correspondingly loose tolerance.
    out_bf16 = jax.block_until_ready(
        resblock2d_pallas(x, w1, g1, b1, w2, g2, b2, matmul_dtype=jnp.bfloat16))
    assert jnp.allclose(out_bf16, ref, rtol=1e-1, atol=1e-1), (
        float(jnp.max(jnp.abs(out_bf16 - ref))))

    print("KERNEL_OK")
</pallas_src>

<mosaic_0001>
module attributes {stable_mosaic.version = 11 : i64} {
  func.func @_resblock_kernel(%arg0: i32, %arg1: memref<2x8x256xf32, #tpu.memory_space<vmem>>, %arg2: memref<8x1x256xf32, #tpu.memory_space<vmem>>, %arg3: memref<8x72xf32, #tpu.memory_space<vmem>>, %arg4: memref<8x1xf32, #tpu.memory_space<vmem>>, %arg5: memref<8x1xf32, #tpu.memory_space<vmem>>, %arg6: memref<8x72xf32, #tpu.memory_space<vmem>>, %arg7: memref<8x1xf32, #tpu.memory_space<vmem>>, %arg8: memref<8x1xf32, #tpu.memory_space<vmem>>, %arg9: memref<2x8x256xf32, #tpu.memory_space<vmem>>) attributes {dimension_semantics = [#tpu.dimension_semantics<parallel>], iteration_bounds = array<i64: 1>, scalar_prefetch = 0 : i64, scratch_operands = 0 : i64, tpu.core_type = #tpu.core_type<tc>, window_params = [{transform_indices = @transform_0, window_bounds = array<i64: 2, 8, 256>}, {pipeline_mode = #tpu.pipeline_mode<synchronous>, transform_indices = @transform_1, window_bounds = array<i64: 8, 1, 256>}, {pipeline_mode = #tpu.pipeline_mode<synchronous>, transform_indices = @transform_2, window_bounds = array<i64: 8, 72>}, {pipeline_mode = #tpu.pipeline_mode<synchronous>, transform_indices = @transform_3, window_bounds = array<i64: 8, 1>}, {pipeline_mode = #tpu.pipeline_mode<synchronous>, transform_indices = @transform_4, window_bounds = array<i64: 8, 1>}, {pipeline_mode = #tpu.pipeline_mode<synchronous>, transform_indices = @transform_5, window_bounds = array<i64: 8, 72>}, {pipeline_mode = #tpu.pipeline_mode<synchronous>, transform_indices = @transform_6, window_bounds = array<i64: 8, 1>}, {pipeline_mode = #tpu.pipeline_mode<synchronous>, transform_indices = @transform_7, window_bounds = array<i64: 8, 1>}, {transform_indices = @transform_8, window_bounds = array<i64: 2, 8, 256>}]} {
    %c0 = arith.constant 0 : index
    %c0_0 = arith.constant 0 : index
    %c0_1 = arith.constant 0 : index
    %0 = vector.load %arg1[%c0, %c0_0, %c0_1] : memref<2x8x256xf32, #tpu.memory_space<vmem>>, vector<2x8x256xf32>
    %c17_i32 = arith.constant 17 : i32
    %1 = tpu.dynamic_rotate %0 by %c17_i32 dim 2 : vector<2x8x256xf32>, i32 -> vector<2x8x256xf32>
    %c0_2 = arith.constant 0 : index
    %c0_3 = arith.constant 0 : index
    %c0_4 = arith.constant 0 : index
    %2 = vector.load %arg2[%c0_2, %c0_3, %c0_4] : memref<8x1x256xf32, #tpu.memory_space<vmem>>, vector<1x1x256xf32>
    %3 = vector.shape_cast %2 : vector<1x1x256xf32> to vector<1x256xf32>
    %4 = vector.shape_cast %3 : vector<1x256xf32> to vector<1x1x256xf32>
    %5 = vector.broadcast %4 : vector<1x1x256xf32> to vector<2x8x256xf32>
    %6 = arith.mulf %1, %5 : vector<2x8x256xf32>
    %c16_i32 = arith.constant 16 : i32
    %7 = tpu.dynamic_rotate %0 by %c16_i32 dim 2 : vector<2x8x256xf32>, i32 -> vector<2x8x256xf32>
    %c1 = arith.constant 1 : index
    %c0_5 = arith.constant 0 : index
    %c0_6 = arith.constant 0 : index
    %8 = vector.load %arg2[%c1, %c0_5, %c0_6] : memref<8x1x256xf32, #tpu.memory_space<vmem>>, vector<1x1x256xf32>
    %9 = vector.shape_cast %8 : vector<1x1x256xf32> to vector<1x256xf32>
    %10 = vector.shape_cast %9 : vector<1x256xf32> to vector<1x1x256xf32>
    %11 = vector.broadcast %10 : vector<1x1x256xf32> to vector<2x8x256xf32>
    %12 = arith.mulf %7, %11 : vector<2x8x256xf32>
    %c15_i32 = arith.constant 15 : i32
    %13 = tpu.dynamic_rotate %0 by %c15_i32 dim 2 : vector<2x8x256xf32>, i32 -> vector<2x8x256xf32>
    %c2 = arith.constant 2 : index
    %c0_7 = arith.constant 0 : index
    %c0_8 = arith.constant 0 : index
    %14 = vector.load %arg2[%c2, %c0_7, %c0_8] : memref<8x1x256xf32, #tpu.memory_space<vmem>>, vector<1x1x256xf32>
    %15 = vector.shape_cast %14 : vector<1x1x256xf32> to vector<1x256xf32>
    %16 = vector.shape_cast %15 : vector<1x256xf32> to vector<1x1x256xf32>
    %17 = vector.broadcast %16 : vector<1x1x256xf32> to vector<2x8x256xf32>
    %18 = arith.mulf %13, %17 : vector<2x8x256xf32>
    %c1_i32 = arith.constant 1 : i32
    %19 = tpu.dynamic_rotate %0 by %c1_i32 dim 2 : vector<2x8x256xf32>, i32 -> vector<2x8x256xf32>
    %c3 = arith.constant 3 : index
    %c0_9 = arith.constant 0 : index
    %c0_10 = arith.constant 0 : index
    %20 = vector.load %arg2[%c3, %c0_9, %c0_10] : memref<8x1x256xf32, #tpu.memory_space<vmem>>, vector<1x1x256xf32>
    %21 = vector.shape_cast %20 : vector<1x1x256xf32> to vector<1x256xf32>
    %22 = vector.shape_cast %21 : vector<1x256xf32> to vector<1x1x256xf32>
    %23 = vector.broadcast %22 : vector<1x1x256xf32> to vector<2x8x256xf32>
    %24 = arith.mulf %19, %23 : vector<2x8x256xf32>
    %c255_i32 = arith.constant 255 : i32
    %25 = tpu.dynamic_rotate %0 by %c255_i32 dim 2 : vector<2x8x256xf32>, i32 -> vector<2x8x256xf32>
    %c4 = arith.constant 4 : index
    %c0_11 = arith.constant 0 : index
    %c0_12 = arith.constant 0 : index
    %26 = vector.load %arg2[%c4, %c0_11, %c0_12] : memref<8x1x256xf32, #tpu.memory_space<vmem>>, vector<1x1x256xf32>
    %27 = vector.shape_cast %26 : vector<1x1x256xf32> to vector<1x256xf32>
    %28 = vector.shape_cast %27 : vector<1x256xf32> to vector<1x1x256xf32>
    %29 = vector.broadcast %28 : vector<1x1x256xf32> to vector<2x8x256xf32>
    %30 = arith.mulf %25, %29 : vector<2x8x256xf32>
    %c241_i32 = arith.constant 241 : i32
    %31 = tpu.dynamic_rotate %0 by %c241_i32 dim 2 : vector<2x8x256xf32>, i32 -> vector<2x8x256xf32>
    %c5 = arith.constant 5 : index
    %c0_13 = arith.constant 0 : index
    %c0_14 = arith.constant 0 : index
    %32 = vector.load %arg2[%c5, %c0_13, %c0_14] : memref<8x1x256xf32, #tpu.memory_space<vmem>>, vector<1x1x256xf32>
    %33 = vector.shape_cast %32 : vector<1x1x256xf32> to vector<1x256xf32>
    %34 = vector.shape_cast %33 : vector<1x256xf32> to vector<1x1x256xf32>
    %35 = vector.broadcast %34 : vector<1x1x256xf32> to vector<2x8x256xf32>
    %36 = arith.mulf %31, %35 : vector<2x8x256xf32>
    %c240_i32 = arith.constant 240 : i32
    %37 = tpu.dynamic_rotate %0 by %c240_i32 dim 2 : vector<2x8x256xf32>, i32 -> vector<2x8x256xf32>
    %c6 = arith.constant 6 : index
    %c0_15 = arith.constant 0 : index
    %c0_16 = arith.constant 0 : index
    %38 = vector.load %arg2[%c6, %c0_15, %c0_16] : memref<8x1x256xf32, #tpu.memory_space<vmem>>, vector<1x1x256xf32>
    %39 = vector.shape_cast %38 : vector<1x1x256xf32> to vector<1x256xf32>
    %40 = vector.shape_cast %39 : vector<1x256xf32> to vector<1x1x256xf32>
    %41 = vector.broadcast %40 : vector<1x1x256xf32> to vector<2x8x256xf32>
    %42 = arith.mulf %37, %41 : vector<2x8x256xf32>
    %c239_i32 = arith.constant 239 : i32
    %43 = tpu.dynamic_rotate %0 by %c239_i32 dim 2 : vector<2x8x256xf32>, i32 -> vector<2x8x256xf32>
    %c7 = arith.constant 7 : index
    %c0_17 = arith.constant 0 : index
    %c0_18 = arith.constant 0 : index
    %44 = vector.load %arg2[%c7, %c0_17, %c0_18] : memref<8x1x256xf32, #tpu.memory_space<vmem>>, vector<1x1x256xf32>
    %45 = vector.shape_cast %44 : vector<1x1x256xf32> to vector<1x256xf32>
    %46 = vector.shape_cast %45 : vector<1x256xf32> to vector<1x1x256xf32>
    %47 = vector.broadcast %46 : vector<1x1x256xf32> to vector<2x8x256xf32>
    %48 = arith.mulf %43, %47 : vector<2x8x256xf32>
    %49 = tpu.concatenate %6, %12, %18, %24, %0, %30, %36, %42, %48 in 1 : vector<2x8x256xf32>, vector<2x8x256xf32>, vector<2x8x256xf32>, vector<2x8x256xf32>, vector<2x8x256xf32>, vector<2x8x256xf32>, vector<2x8x256xf32>, vector<2x8x256xf32>, vector<2x8x256xf32> -> vector<2x72x256xf32>
    %c0_19 = arith.constant 0 : index
    %c0_20 = arith.constant 0 : index
    %50 = vector.load %arg3[%c0_19, %c0_20] : memref<8x72xf32, #tpu.memory_space<vmem>>, vector<8x72xf32>
    %51 = vector.shape_cast %50 : vector<8x72xf32> to vector<1x8x72xf32>
    %52 = vector.broadcast %51 : vector<1x8x72xf32> to vector<2x8x72xf32>
    "tpu.trace_start"() <{level = 10 : i32, message = "bck,bkp->bcp"}> : () -> ()
    %cst = arith.constant dense<0.000000e+00> : vector<2x8x256xf32>
    %53 = tpu.matmul %52, %49, %cst {dimension_numbers = #tpu.dot_dimension_numbers<[2], [1], [1], [2], [0, 0, 0, 1, 1, 2], [0], [0]>} : vector<2x8x72xf32>, vector<2x72x256xf32>, vector<2x8x256xf32> -> vector<2x8x256xf32>
    "tpu.trace_stop"() : () -> ()
    %cst_21 = arith.constant dense<0.000000e+00> : vector<2x8xf32>
    %54 = vector.multi_reduction <add>, %53, %cst_21 [2] : vector<2x8x256xf32> to vector<2x8xf32>
    %55 = vector.shape_cast %54 : vector<2x8xf32> to vector<2x8x1xf32>
    %cst_22 = arith.constant 3.906250e-03 : f32
    %56 = vector.broadcast %cst_22 : f32 to vector<2x8x1xf32>
    %57 = arith.mulf %55, %56 : vector<2x8x1xf32>
    %58 = arith.mulf %53, %53 : vector<2x8x256xf32>
    %cst_23 = arith.constant dense<0.000000e+00> : vector<2x8xf32>
    %59 = vector.multi_reduction <add>, %58, %cst_23 [2] : vector<2x8x256xf32> to vector<2x8xf32>
    %60 = vector.shape_cast %59 : vector<2x8xf32> to vector<2x8x1xf32>
    %cst_24 = arith.constant 3.906250e-03 : f32
    %61 = vector.broadcast %cst_24 : f32 to vector<2x8x1xf32>
    %62 = arith.mulf %60, %61 : vector<2x8x1xf32>
    %63 = arith.mulf %57, %57 : vector<2x8x1xf32>
    %64 = arith.subf %62, %63 : vector<2x8x1xf32>
    %cst_25 = arith.constant 0.000000e+00 : f32
    %65 = vector.broadcast %cst_25 : f32 to vector<2x8x1xf32>
    %66 = arith.maximumf %64, %65 : vector<2x8x1xf32>
    %cst_26 = arith.constant 9.99999997E-7 : f32
    %67 = vector.broadcast %cst_26 : f32 to vector<2x8x1xf32>
    %68 = arith.addf %66, %67 : vector<2x8x1xf32>
    %69 = math.rsqrt %68 : vector<2x8x1xf32>
    %c0_27 = arith.constant 0 : index
    %c0_28 = arith.constant 0 : index
    %70 = vector.load %arg4[%c0_27, %c0_28] : memref<8x1xf32, #tpu.memory_space<vmem>>, vector<8x1xf32>
    %71 = vector.shape_cast %70 : vector<8x1xf32> to vector<1x8x1xf32>
    %72 = vector.broadcast %71 : vector<1x8x1xf32> to vector<2x8x1xf32>
    %73 = arith.mulf %69, %72 : vector<2x8x1xf32>
    %c0_29 = arith.constant 0 : index
    %c0_30 = arith.constant 0 : index
    %74 = vector.load %arg5[%c0_29, %c0_30] : memref<8x1xf32, #tpu.memory_space<vmem>>, vector<8x1xf32>
    %75 = arith.mulf %57, %73 : vector<2x8x1xf32>
    %76 = vector.shape_cast %74 : vector<8x1xf32> to vector<1x8x1xf32>
    %77 = vector.broadcast %76 : vector<1x8x1xf32> to vector<2x8x1xf32>
    %78 = arith.subf %77, %75 : vector<2x8x1xf32>
    %79 = vector.broadcast %73 : vector<2x8x1xf32> to vector<2x8x256xf32>
    %80 = arith.mulf %53, %79 : vector<2x8x256xf32>
    %81 = vector.broadcast %78 : vector<2x8x1xf32> to vector<2x8x256xf32>
    %82 = arith.addf %80, %81 : vector<2x8x256xf32>
    %cst_31 = arith.constant 0.000000e+00 : f32
    %83 = vector.broadcast %cst_31 : f32 to vector<2x8x256xf32>
    %84 = arith.cmpf ogt, %82, %83 : vector<2x8x256xf32>
    %cst_32 = arith.constant 0.000000e+00 : f32
    %85 = vector.broadcast %cst_32 : f32 to vector<2x8x256xf32>
    %86 = arith.minimumf %82, %85 : vector<2x8x256xf32>
    %87 = math.exp %86 : vector<2x8x256xf32>
    %cst_33 = arith.constant 1.000000e+00 : f32
    %88 = vector.broadcast %cst_33 : f32 to vector<2x8x256xf32>
    %89 = arith.subf %87, %88 : vector<2x8x256xf32>
    %90 = arith.select %84, %82, %89 : vector<2x8x256xi1>, vector<2x8x256xf32>
    %c17_i32_34 = arith.constant 17 : i32
    %91 = tpu.dynamic_rotate %90 by %c17_i32_34 dim 2 : vector<2x8x256xf32>, i32 -> vector<2x8x256xf32>
    %c0_35 = arith.constant 0 : index
    %c0_36 = arith.constant 0 : index
    %c0_37 = arith.constant 0 : index
    %92 = vector.load %arg2[%c0_35, %c0_36, %c0_37] : memref<8x1x256xf32, #tpu.memory_space<vmem>>, vector<1x1x256xf32>
    %93 = vector.shape_cast %92 : vector<1x1x256xf32> to vector<1x256xf32>
    %94 = vector.shape_cast %93 : vector<1x256xf32> to vector<1x1x256xf32>
    %95 = vector.broadcast %94 : vector<1x1x256xf32> to vector<2x8x256xf32>
    %96 = arith.mulf %91, %95 : vector<2x8x256xf32>
    %c16_i32_38 = arith.constant 16 : i32
    %97 = tpu.dynamic_rotate %90 by %c16_i32_38 dim 2 : vector<2x8x256xf32>, i32 -> vector<2x8x256xf32>
    %c1_39 = arith.constant 1 : index
    %c0_40 = arith.constant 0 : index
    %c0_41 = arith.constant 0 : index
    %98 = vector.load %arg2[%c1_39, %c0_40, %c0_41] : memref<8x1x256xf32, #tpu.memory_space<vmem>>, vector<1x1x256xf32>
    %99 = vector.shape_cast %98 : vector<1x1x256xf32> to vector<1x256xf32>
    %100 = vector.shape_cast %99 : vector<1x256xf32> to vector<1x1x256xf32>
    %101 = vector.broadcast %100 : vector<1x1x256xf32> to vector<2x8x256xf32>
    %102 = arith.mulf %97, %101 : vector<2x8x256xf32>
    %c15_i32_42 = arith.constant 15 : i32
    %103 = tpu.dynamic_rotate %90 by %c15_i32_42 dim 2 : vector<2x8x256xf32>, i32 -> vector<2x8x256xf32>
    %c2_43 = arith.constant 2 : index
    %c0_44 = arith.constant 0 : index
    %c0_45 = arith.constant 0 : index
    %104 = vector.load %arg2[%c2_43, %c0_44, %c0_45] : memref<8x1x256xf32, #tpu.memory_space<vmem>>, vector<1x1x256xf32>
    %105 = vector.shape_cast %104 : vector<1x1x256xf32> to vector<1x256xf32>
    %106 = vector.shape_cast %105 : vector<1x256xf32> to vector<1x1x256xf32>
    %107 = vector.broadcast %106 : vector<1x1x256xf32> to vector<2x8x256xf32>
    %108 = arith.mulf %103, %107 : vector<2x8x256xf32>
    %c1_i32_46 = arith.constant 1 : i32
    %109 = tpu.dynamic_rotate %90 by %c1_i32_46 dim 2 : vector<2x8x256xf32>, i32 -> vector<2x8x256xf32>
    %c3_47 = arith.constant 3 : index
    %c0_48 = arith.constant 0 : index
    %c0_49 = arith.constant 0 : index
    %110 = vector.load %arg2[%c3_47, %c0_48, %c0_49] : memref<8x1x256xf32, #tpu.memory_space<vmem>>, vector<1x1x256xf32>
    %111 = vector.shape_cast %110 : vector<1x1x256xf32> to vector<1x256xf32>
    %112 = vector.shape_cast %111 : vector<1x256xf32> to vector<1x1x256xf32>
    %113 = vector.broadcast %112 : vector<1x1x256xf32> to vector<2x8x256xf32>
    %114 = arith.mulf %109, %113 : vector<2x8x256xf32>
    %c255_i32_50 = arith.constant 255 : i32
    %115 = tpu.dynamic_rotate %90 by %c255_i32_50 dim 2 : vector<2x8x256xf32>, i32 -> vector<2x8x256xf32>
    %c4_51 = arith.constant 4 : index
    %c0_52 = arith.constant 0 : index
    %c0_53 = arith.constant 0 : index
    %116 = vector.load %arg2[%c4_51, %c0_52, %c0_53] : memref<8x1x256xf32, #tpu.memory_space<vmem>>, vector<1x1x256xf32>
    %117 = vector.shape_cast %116 : vector<1x1x256xf32> to vector<1x256xf32>
    %118 = vector.shape_cast %117 : vector<1x256xf32> to vector<1x1x256xf32>
    %119 = vector.broadcast %118 : vector<1x1x256xf32> to vector<2x8x256xf32>
    %120 = arith.mulf %115, %119 : vector<2x8x256xf32>
    %c241_i32_54 = arith.constant 241 : i32
    %121 = tpu.dynamic_rotate %90 by %c241_i32_54 dim 2 : vector<2x8x256xf32>, i32 -> vector<2x8x256xf32>
    %c5_55 = arith.constant 5 : index
    %c0_56 = arith.constant 0 : index
    %c0_57 = arith.constant 0 : index
    %122 = vector.load %arg2[%c5_55, %c0_56, %c0_57] : memref<8x1x256xf32, #tpu.memory_space<vmem>>, vector<1x1x256xf32>
    %123 = vector.shape_cast %122 : vector<1x1x256xf32> to vector<1x256xf32>
    %124 = vector.shape_cast %123 : vector<1x256xf32> to vector<1x1x256xf32>
    %125 = vector.broadcast %124 : vector<1x1x256xf32> to vector<2x8x256xf32>
    %126 = arith.mulf %121, %125 : vector<2x8x256xf32>
    %c240_i32_58 = arith.constant 240 : i32
    %127 = tpu.dynamic_rotate %90 by %c240_i32_58 dim 2 : vector<2x8x256xf32>, i32 -> vector<2x8x256xf32>
    %c6_59 = arith.constant 6 : index
    %c0_60 = arith.constant 0 : index
    %c0_61 = arith.constant 0 : index
    %128 = vector.load %arg2[%c6_59, %c0_60, %c0_61] : memref<8x1x256xf32, #tpu.memory_space<vmem>>, vector<1x1x256xf32>
    %129 = vector.shape_cast %128 : vector<1x1x256xf32> to vector<1x256xf32>
    %130 = vector.shape_cast %129 : vector<1x256xf32> to vector<1x1x256xf32>
    %131 = vector.broadcast %130 : vector<1x1x256xf32> to vector<2x8x256xf32>
    %132 = arith.mulf %127, %131 : vector<2x8x256xf32>
    %c239_i32_62 = arith.constant 239 : i32
    %133 = tpu.dynamic_rotate %90 by %c239_i32_62 dim 2 : vector<2x8x256xf32>, i32 -> vector<2x8x256xf32>
    %c7_63 = arith.constant 7 : index
    %c0_64 = arith.constant 0 : index
    %c0_65 = arith.constant 0 : index
    %134 = vector.load %arg2[%c7_63, %c0_64, %c0_65] : memref<8x1x256xf32, #tpu.memory_space<vmem>>, vector<1x1x256xf32>
    %135 = vector.shape_cast %134 : vector<1x1x256xf32> to vector<1x256xf32>
    %136 = vector.shape_cast %135 : vector<1x256xf32> to vector<1x1x256xf32>
    %137 = vector.broadcast %136 : vector<1x1x256xf32> to vector<2x8x256xf32>
    %138 = arith.mulf %133, %137 : vector<2x8x256xf32>
    %139 = tpu.concatenate %96, %102, %108, %114, %90, %120, %126, %132, %138 in 1 : vector<2x8x256xf32>, vector<2x8x256xf32>, vector<2x8x256xf32>, vector<2x8x256xf32>, vector<2x8x256xf32>, vector<2x8x256xf32>, vector<2x8x256xf32>, vector<2x8x256xf32>, vector<2x8x256xf32> -> vector<2x72x256xf32>
    %c0_66 = arith.constant 0 : index
    %c0_67 = arith.constant 0 : index
    %140 = vector.load %arg6[%c0_66, %c0_67] : memref<8x72xf32, #tpu.memory_space<vmem>>, vector<8x72xf32>
    %141 = vector.shape_cast %140 : vector<8x72xf32> to vector<1x8x72xf32>
    %142 = vector.broadcast %141 : vector<1x8x72xf32> to vector<2x8x72xf32>
    "tpu.trace_start"() <{level = 10 : i32, message = "bck,bkp->bcp"}> : () -> ()
    %cst_68 = arith.constant dense<0.000000e+00> : vector<2x8x256xf32>
    %143 = tpu.matmul %142, %139, %cst_68 {dimension_numbers = #tpu.dot_dimension_numbers<[2], [1], [1], [2], [0, 0, 0, 1, 1, 2], [0], [0]>} : vector<2x8x72xf32>, vector<2x72x256xf32>, vector<2x8x256xf32> -> vector<2x8x256xf32>
    "tpu.trace_stop"() : () -> ()
    %cst_69 = arith.constant dense<0.000000e+00> : vector<2x8xf32>
    %144 = vector.multi_reduction <add>, %143, %cst_69 [2] : vector<2x8x256xf32> to vector<2x8xf32>
    %145 = vector.shape_cast %144 : vector<2x8xf32> to vector<2x8x1xf32>
    %cst_70 = arith.constant 3.906250e-03 : f32
    %146 = vector.broadcast %cst_70 : f32 to vector<2x8x1xf32>
    %147 = arith.mulf %145, %146 : vector<2x8x1xf32>
    %148 = arith.mulf %143, %143 : vector<2x8x256xf32>
    %cst_71 = arith.constant dense<0.000000e+00> : vector<2x8xf32>
    %149 = vector.multi_reduction <add>, %148, %cst_71 [2] : vector<2x8x256xf32> to vector<2x8xf32>
    %150 = vector.shape_cast %149 : vector<2x8xf32> to vector<2x8x1xf32>
    %cst_72 = arith.constant 3.906250e-03 : f32
    %151 = vector.broadcast %cst_72 : f32 to vector<2x8x1xf32>
    %152 = arith.mulf %150, %151 : vector<2x8x1xf32>
    %153 = arith.mulf %147, %147 : vector<2x8x1xf32>
    %154 = arith.subf %152, %153 : vector<2x8x1xf32>
    %cst_73 = arith.constant 0.000000e+00 : f32
    %155 = vector.broadcast %cst_73 : f32 to vector<2x8x1xf32>
    %156 = arith.maximumf %154, %155 : vector<2x8x1xf32>
    %cst_74 = arith.constant 9.99999997E-7 : f32
    %157 = vector.broadcast %cst_74 : f32 to vector<2x8x1xf32>
    %158 = arith.addf %156, %157 : vector<2x8x1xf32>
    %159 = math.rsqrt %158 : vector<2x8x1xf32>
    %c0_75 = arith.constant 0 : index
    %c0_76 = arith.constant 0 : index
    %160 = vector.load %arg7[%c0_75, %c0_76] : memref<8x1xf32, #tpu.memory_space<vmem>>, vector<8x1xf32>
    %161 = vector.shape_cast %160 : vector<8x1xf32> to vector<1x8x1xf32>
    %162 = vector.broadcast %161 : vector<1x8x1xf32> to vector<2x8x1xf32>
    %163 = arith.mulf %159, %162 : vector<2x8x1xf32>
    %c0_77 = arith.constant 0 : index
    %c0_78 = arith.constant 0 : index
    %164 = vector.load %arg8[%c0_77, %c0_78] : memref<8x1xf32, #tpu.memory_space<vmem>>, vector<8x1xf32>
    %165 = arith.mulf %147, %163 : vector<2x8x1xf32>
    %166 = vector.shape_cast %164 : vector<8x1xf32> to vector<1x8x1xf32>
    %167 = vector.broadcast %166 : vector<1x8x1xf32> to vector<2x8x1xf32>
    %168 = arith.subf %167, %165 : vector<2x8x1xf32>
    %169 = vector.broadcast %163 : vector<2x8x1xf32> to vector<2x8x256xf32>
    %170 = arith.mulf %143, %169 : vector<2x8x256xf32>
    %171 = vector.broadcast %168 : vector<2x8x1xf32> to vector<2x8x256xf32>
    %172 = arith.addf %170, %171 : vector<2x8x256xf32>
    %173 = arith.addf %0, %172 : vector<2x8x256xf32>
    %cst_79 = arith.constant 0.000000e+00 : f32
    %174 = vector.broadcast %cst_79 : f32 to vector<2x8x256xf32>
    %175 = arith.cmpf ogt, %173, %174 : vector<2x8x256xf32>
    %cst_80 = arith.constant 0.000000e+00 : f32
    %176 = vector.broadcast %cst_80 : f32 to vector<2x8x256xf32>
    %177 = arith.minimumf %173, %176 : vector<2x8x256xf32>
    %178 = math.exp %177 : vector<2x8x256xf32>
    %cst_81 = arith.constant 1.000000e+00 : f32
    %179 = vector.broadcast %cst_81 : f32 to vector<2x8x256xf32>
    %180 = arith.subf %178, %179 : vector<2x8x256xf32>
    %181 = arith.select %175, %173, %180 : vector<2x8x256xi1>, vector<2x8x256xf32>
    %c0_82 = arith.constant 0 : index
    %c0_83 = arith.constant 0 : index
    %c0_84 = arith.constant 0 : index
    %182 = vector.load %arg9[%c0_82, %c0_83, %c0_84] : memref<2x8x256xf32, #tpu.memory_space<vmem>>, vector<2x8x256xf32>
    tpu.vector_store %arg9[%c0_82, %c0_83, %c0_84], %181 {strides = array<i32>} : memref<2x8x256xf32, #tpu.memory_space<vmem>>, vector<2x8x256xf32>,
    return
  }
  func.func @transform_0(%arg0: i32) -> (i32, i32, i32) {
    %c0_i32 = arith.constant 0 : i32
    %c0_i32_0 = arith.constant 0 : i32
    %c0_i32_1 = arith.constant 0 : i32
    return %arg0, %c0_i32, %c0_i32_0 : i32, i32, i32
  }
  func.func @transform_1(%arg0: i32) -> (i32, i32, i32) {
    %c0_i32 = arith.constant 0 : i32
    %c0_i32_0 = arith.constant 0 : i32
    %c0_i32_1 = arith.constant 0 : i32
    %c0_i32_2 = arith.constant 0 : i32
    return %c0_i32, %c0_i32_0, %c0_i32_1 : i32, i32, i32
  }
  func.func @transform_2(%arg0: i32) -> (i32, i32) {
    %c0_i32 = arith.constant 0 : i32
    %c0_i32_0 = arith.constant 0 : i32
    %c0_i32_1 = arith.constant 0 : i32
    return %c0_i32, %c0_i32_0 : i32, i32
  }
  func.func @transform_3(%arg0: i32) -> (i32, i32) {
    %c0_i32 = arith.constant 0 : i32
    %c0_i32_0 = arith.constant 0 : i32
    %c0_i32_1 = arith.constant 0 : i32
    return %c0_i32, %c0_i32_0 : i32, i32
  }
  func.func @transform_4(%arg0: i32) -> (i32, i32) {
    %c0_i32 = arith.constant 0 : i32
    %c0_i32_0 = arith.constant 0 : i32
    %c0_i32_1 = arith.constant 0 : i32
    return %c0_i32, %c0_i32_0 : i32, i32
  }
  func.func @transform_5(%arg0: i32) -> (i32, i32) {
    %c0_i32 = arith.constant 0 : i32
    %c0_i32_0 = arith.constant 0 : i32
    %c0_i32_1 = arith.constant 0 : i32
    return %c0_i32, %c0_i32_0 : i32, i32
  }
  func.func @transform_6(%arg0: i32) -> (i32, i32) {
    %c0_i32 = arith.constant 0 : i32
    %c0_i32_0 = arith.constant 0 : i32
    %c0_i32_1 = arith.constant 0 : i32
    return %c0_i32, %c0_i32_0 : i32, i32
  }
  func.func @transform_7(%arg0: i32) -> (i32, i32) {
    %c0_i32 = arith.constant 0 : i32
    %c0_i32_0 = arith.constant 0 : i32
    %c0_i32_1 = arith.constant 0 : i32
    return %c0_i32, %c0_i32_0 : i32, i32
  }
  func.func @transform_8(%arg0: i32) -> (i32, i32, i32) {
    %c0_i32 = arith.constant 0 : i32
    %c0_i32_0 = arith.constant 0 : i32
    %c0_i32_1 = arith.constant 0 : i32
    return %arg0, %c0_i32, %c0_i32_0 : i32, i32, i32
  }
}

</mosaic_0001>

<bundles_post_ra>
// kernel: resblock2d_pallas.1
= control target key start
LH: loop header
LB: loop body
LE: loop exit
PB: predicated region body
PF: predicated region fallthrough
CT: control target
= control target key end

     0   :  { %s1113_s9 = smov 17   ;;  %s1114_s14 = smov 16   ;;  %v1120_v4 = vmov 0.0   ;;  %v41_v5 = vlaneseq  ;;  %vm275_vm8 = vcmask 588800   ;;  %s1636_s0 = inlined_call_operand.vmem [shape: f32[2,8,256], index: 0, kind: input, shape index: {}]   ;;  %s1637_s1 = inlined_call_operand.vmem [shape: f32[8,1,256], index: 1, kind: input, shape index: {}]   ;;  %s1638_s2 = inlined_call_operand.vmem [shape: f32[8,72], index: 2, kind: input, shape index: {}]   ;;  %s1639_s3 = inlined_call_operand.vmem [shape: f32[8,1], index: 3, kind: input, shape index: {}]   ;;  %s1640_s4 = inlined_call_operand.vmem [shape: f32[8,1], index: 4, kind: input, shape index: {}]   ;;  %s1641_s5 = inlined_call_operand.vmem [shape: f32[8,72], index: 5, kind: input, shape index: {}]   ;;  %s1642_s6 = inlined_call_operand.vmem [shape: f32[8,1], index: 6, kind: input, shape index: {}]   ;;  %s1643_s7 = inlined_call_operand.vmem [shape: f32[8,1], index: 7, kind: input, shape index: {}]   ;;  %s1644_s8 = inlined_call_operand.vmem [shape: f32[2,8,256], index: 8, kind: output, shape index: {}]  }
   0x1   :  { %v1171_v0 = vld [vmem:[%s1636_s0 + $0x8] sm:$0xff]  ;;  %v1176_v1 = vld [vmem:[%s1636_s0] sm:$0xff]  ;;  %v1185_v2 = vld [vmem:[%s1636_s0 + $0x18] sm:$0xff]  ;;  %s1115_s15 = smov 15   ;;  %s1116_s16 = smov 1   ;;  %343 = vmatprep.mubr.f32.mxu0 %v1120_v4  ;;  %414 = vmatprep.mubr.f32.mxu1 %v1120_v4 }
   0x2   :  { %37 = vrot.lane.b32.xlu1 %v1171_v0, %s1113_s9  ;;  %33 = vrot.lane.b32.xlu0 %v1176_v1, %s1113_s9  ;;  %v1190_v3 = vld [vmem:[%s1636_s0 + $0x10] sm:$0xff]  ;;  %s1117_s17 = smov 127   ;;  %s1118_s18 = smov 113   ;;  %v51_v7 = vshrl.u32 %v41_v5, 7  ;;  %v1254_v9 = vand.u32 127, %v41_v5 }
   0x3   :  { %s1119_s19 = smov 112   ;;  %s1121_s20 = smov 111   ;;  %v48_v14 = vld [vmem:[%s1637_s1] sm:$0x3]  ;;  %v983_v15 = vld [vmem:[%s1637_s1 + $0x2] sm:$0x3] }
   0x4   :  { %v1256_v10 = vsub.s32 0, %v51_v7  ;;  %v1258_v11 = vsub.s32 1, %v51_v7  ;;  %vm43_vm0 = vcmp.lt.s32.totalorder %v1254_v9, 17  ;;  %vm72_vm1 = vcmp.lt.s32.totalorder %v1254_v9, 16  ;;  %v984_v48 = vld [vmem:[%s1637_s1 + $0x4] sm:$0x3] }
   0x5   :  { %vm102_vm2 = vcmp.lt.s32.totalorder %v1254_v9, 15  ;;  %v985_v49 = vld [vmem:[%s1637_s1 + $0x6] sm:$0x3]  ;;  %vm132_vm3 = vcmp.lt.s32.totalorder %v1254_v9, 1  ;;  %vm162_vm4 = vcmp.lt.s32.totalorder %v1254_v9, 127  ;;  %vm192_vm5 = vcmp.lt.s32.totalorder %v1254_v9, 113 }
   0x6   :  { %39 = vrot.lane.b32.xlu1 %v1185_v2, %s1113_s9  ;;  %35 = vrot.lane.b32.xlu0 %v1190_v3, %s1113_s9  ;;  %v53_v16 = vrot.slane %v48_v14, %v1256_v10  ;;  %v57_v19 = vrot.slane %v48_v14, %v1258_v11  ;;  %v83_v24 = vrot.slane %v983_v15, %v1256_v10  ;;  %vm222_vm6 = vcmp.lt.s32.totalorder %v1254_v9, 112 }
   0x7   :  { %v87_v25 = vrot.slane %v983_v15, %v1258_v11  ;;  %v113_v50 = vrot.slane %v984_v48, %v1256_v10  ;;  %v117_v51 = vrot.slane %v984_v48, %v1258_v11  ;;  %v143_v58 = vrot.slane %v985_v49, %v1256_v10 }
   0x8   :  { %v147_v59 = vrot.slane %v985_v49, %v1258_v11  ;;  %vm252_vm7 = vcmp.lt.s32.totalorder %v1254_v9, 111 }
   0xa   :  { %66 = vrot.lane.b32.xlu1 %v1190_v3, %s1114_s14  ;;  %64 = vrot.lane.b32.xlu0 %v1176_v1, %s1114_s14 }
   0xe   :  { %70 = vrot.lane.b32.xlu1 %v1185_v2, %s1114_s14  ;;  %68 = vrot.lane.b32.xlu0 %v1171_v0, %s1114_s14 }
  0x12   :  { %96 = vrot.lane.b32.xlu1 %v1190_v3, %s1115_s15  ;;  %94 = vrot.lane.b32.xlu0 %v1176_v1, %s1115_s15 }
  0x16   :  { %100 = vrot.lane.b32.xlu1 %v1185_v2, %s1115_s15  ;;  %98 = vrot.lane.b32.xlu0 %v1171_v0, %s1115_s15 }
  0x1a   :  { %126 = vrot.lane.b32.xlu1 %v1190_v3, %s1116_s16  ;;  %124 = vrot.lane.b32.xlu0 %v1176_v1, %s1116_s16 }
  0x1e   :  { %130 = vrot.lane.b32.xlu1 %v1185_v2, %s1116_s16  ;;  %128 = vrot.lane.b32.xlu0 %v1171_v0, %s1116_s16 }
  0x22   :  { %156 = vrot.lane.b32.xlu1 %v1190_v3, %s1117_s17  ;;  %154 = vrot.lane.b32.xlu0 %v1176_v1, %s1117_s17 }
  0x26   :  { %160 = vrot.lane.b32.xlu1 %v1185_v2, %s1117_s17  ;;  %158 = vrot.lane.b32.xlu0 %v1171_v0, %s1117_s17 }
  0x2a   :  { %186 = vrot.lane.b32.xlu1 %v1190_v3, %s1118_s18  ;;  %184 = vrot.lane.b32.xlu0 %v1176_v1, %s1118_s18 }
  0x2e   :  { %190 = vrot.lane.b32.xlu1 %v1185_v2, %s1118_s18  ;;  %188 = vrot.lane.b32.xlu0 %v1171_v0, %s1118_s18 }
  0x32   :  { %216 = vrot.lane.b32.xlu1 %v1190_v3, %s1119_s19  ;;  %214 = vrot.lane.b32.xlu0 %v1176_v1, %s1119_s19 }
  0x36   :  { %220 = vrot.lane.b32.xlu1 %v1185_v2, %s1119_s19  ;;  %218 = vrot.lane.b32.xlu0 %v1171_v0, %s1119_s19 }
  0x3a   :  { %244 = vrot.lane.b32.xlu0 %v1176_v1, %s1121_s20  ;;  %246 = vrot.lane.b32.xlu1 %v1190_v3, %s1121_s20 }
  0x3e   :  { %248 = vrot.lane.b32.xlu0 %v1171_v0, %s1121_s20  ;;  %250 = vrot.lane.b32.xlu1 %v1185_v2, %s1121_s20 }
  0x74   :  { %v38_v6 = vpop.permute.xlu1 %37  ;;  %v34_v8 = vpop.permute.xlu0 %33 }
  0x75   :  { %v44_v20 = vsel %vm43_vm0, %v34_v8, %v38_v6  ;;  %v46_v21 = vsel %vm43_vm0, %v38_v6, %v34_v8 }
  0x76   :  { %v60_v26 = vmul.f32 %v53_v16, %v46_v21  ;;  %v61_v30 = vmul.f32 %v57_v19, %v44_v20 }
  0x78   :  { %v40_v12 = vpop.permute.xlu1 %39  ;;  %v36_v13 = vpop.permute.xlu0 %35 }
  0x79   :  { %v45_v22 = vsel %vm43_vm0, %v36_v13, %v40_v12  ;;  %v47_v23 = vsel %vm43_vm0, %v40_v12, %v36_v13 }
  0x7a   :  { %v62_v27 = vmul.f32 %v53_v16, %v47_v23  ;;  %v63_v31 = vmul.f32 %v57_v19, %v45_v22 }
  0x7c   :  { %v67_v17 = vpop.permute.xlu1 %66  ;;  %v65_v18 = vpop.permute.xlu0 %64 }
  0x80   :  { %v71_v28 = vpop.permute.xlu1 %70  ;;  %v69_v29 = vpop.permute.xlu0 %68 }
  0x81   :  { %v74_v32 = vsel %vm72_vm1, %v67_v17, %v71_v28  ;;  %v76_v33 = vsel %vm72_vm1, %v71_v28, %v67_v17  ;;  %v73_v34 = vsel %vm72_vm1, %v65_v18, %v69_v29  ;;  %v75_v35 = vsel %vm72_vm1, %v69_v29, %v65_v18  ;;  %v986_v18 = vld [vmem:[%s1637_s1 + $0x8] sm:$0x3] }
  0x82   :  { %v92_v36 = vmul.f32 %v83_v24, %v76_v33  ;;  %v90_v37 = vmul.f32 %v83_v24, %v75_v35  ;;  %v91_v38 = vmul.f32 %v87_v25, %v73_v34  ;;  %v93_v39 = vmul.f32 %v87_v25, %v74_v32 }
  0x83   :  { %v173_v25 = vrot.slane %v986_v18, %v1256_v10 }
  0x84   :  { %v97_v40 = vpop.permute.xlu1 %96  ;;  %v95_v41 = vpop.permute.xlu0 %94  ;;  %v1009_v42 = vpack.c.bf16 %v91_v38, %v61_v30  ;;  %v1025_v43 = vpack.c.bf16 %v93_v39, %v63_v31  ;;  %v1011_v44 = vpack.c.bf16 %v90_v37, %v60_v26  ;;  %v1027_v45 = vpack.c.bf16 %v92_v36, %v62_v27 }
  0x85   :  { %v177_v26 = vrot.slane %v986_v18, %v1258_v11 }
  0x86   :  { %1010 = vmatprep.subr.bf16.mxu0 %v1009_v42  ;;  %1026 = vmatprep.subr.bf16.mxu1 %v1025_v43 }
  0x87   :  { %1012 = vmatpush1.bf16.msra.mxu0 %v1011_v44  ;;  %1028 = vmatpush1.bf16.msra.mxu1 %v1027_v45  ;;  %v987_v45 = vld [vmem:[%s1637_s1 + $0xa] sm:$0x3] }
  0x88   :  { %v101_v46 = vpop.permute.xlu1 %100  ;;  %v99_v47 = vpop.permute.xlu0 %98 }
  0x89   :  { %v104_v54 = vsel %vm102_vm2, %v97_v40, %v101_v46  ;;  %v106_v55 = vsel %vm102_vm2, %v101_v46, %v97_v40  ;;  %v103_v56 = vsel %vm102_vm2, %v95_v41, %v99_v47  ;;  %v105_v57 = vsel %vm102_vm2, %v99_v47, %v95_v41 }
  0x8a   :  { %v122_v60 = vmul.f32 %v113_v50, %v106_v55  ;;  %v123_v61 = vmul.f32 %v117_v51, %v104_v54  ;;  %v120_v62 = vmul.f32 %v113_v50, %v105_v57  ;;  %v121_v63 = vmul.f32 %v117_v51, %v103_v56 }
  0x8c   :  { %v127_v52 = vpop.permute.xlu1 %126  ;;  %v125_v53 = vpop.permute.xlu0 %124 }
  0x90   :  { %v131_v5 = vpop.permute.xlu1 %130  ;;  %v129_v6 = vpop.permute.xlu0 %128 }
  0x91   :  { %v134_v7 = vsel %vm132_vm3, %v127_v52, %v131_v5  ;;  %v136_v8 = vsel %vm132_vm3, %v131_v5, %v127_v52  ;;  %v133_v12 = vsel %vm132_vm3, %v125_v53, %v129_v6  ;;  %v135_v13 = vsel %vm132_vm3, %v129_v6, %v125_v53 }
  0x92   :  { %v152_v14 = vmul.f32 %v143_v58, %v136_v8  ;;  %v153_v15 = vmul.f32 %v147_v59, %v134_v7  ;;  %v150_v16 = vmul.f32 %v143_v58, %v135_v13  ;;  %v151_v17 = vmul.f32 %v147_v59, %v133_v12  ;;  %v989_v8 = vld [vmem:[%s1637_s1 + $0xe] sm:$0x3] }
  0x93   :  { %v263_v18 = vrot.slane %v989_v8, %v1256_v10 }
  0x94   :  { %v157_v19 = vpop.permute.xlu1 %156  ;;  %v155_v20 = vpop.permute.xlu0 %154  ;;  %v1013_v21 = vpack.c.bf16 %v151_v17, %v121_v63  ;;  %v1029_v22 = vpack.c.bf16 %v153_v15, %v123_v61  ;;  %v1015_v23 = vpack.c.bf16 %v150_v16, %v120_v62  ;;  %v1031_v24 = vpack.c.bf16 %v152_v14, %v122_v60 }
  0x96   :  { %1014 = vmatprep.subr.bf16.mxu0 %v1013_v21  ;;  %1030 = vmatprep.subr.bf16.mxu1 %v1029_v22 }
  0x97   :  { %1016 = vmatpush1.bf16.msra.mxu0 %v1015_v23  ;;  %1032 = vmatpush1.bf16.msra.mxu1 %v1031_v24 }
  0x98   :  { %v161_v27 = vpop.permute.xlu1 %160  ;;  %v159_v28 = vpop.permute.xlu0 %158 }
  0x99   :  { %v164_v29 = vsel %vm162_vm4, %v157_v19, %v161_v27  ;;  %v166_v30 = vsel %vm162_vm4, %v161_v27, %v157_v19  ;;  %v163_v31 = vsel %vm162_vm4, %v155_v20, %v159_v28  ;;  %v165_v32 = vsel %vm162_vm4, %v159_v28, %v155_v20 }
  0x9a   :  { %v182_v33 = vmul.f32 %v173_v25, %v164_v29  ;;  %v183_v34 = vmul.f32 %v177_v26, %v166_v30  ;;  %v180_v35 = vmul.f32 %v173_v25, %v163_v31  ;;  %v181_v36 = vmul.f32 %v177_v26, %v165_v32  ;;  %v274_v30 = vld [vmem:[%s1638_s2] sm:$0xff] }
  0x9b   :  { %v267_v19 = vrot.slane %v989_v8, %v1258_v11 }
  0x9c   :  { %v187_v37 = vpop.permute.xlu1 %186  ;;  %v185_v38 = vpop.permute.xlu0 %184  ;;  %v1017_v39 = vpack.c.bf16 %v181_v36, %v1171_v0  ;;  %v1019_v40 = vpack.c.bf16 %v180_v35, %v1176_v1  ;;  %v1033_v41 = vpack.c.bf16 %v183_v34, %v1185_v2  ;;  %v1035_v42 = vpack.c.bf16 %v182_v33, %v1190_v3  ;;  %v988_v0 = vld [vmem:[%s1637_s1 + $0xc] sm:$0x3] }
  0x9d   :  { %v203_v1 = vrot.slane %v987_v45, %v1256_v10  ;;  %v207_v2 = vrot.slane %v987_v45, %v1258_v11  ;;  %v233_v51 = vrot.slane %v988_v0, %v1256_v10  ;;  %v237_v52 = vrot.slane %v988_v0, %v1258_v11 }
  0x9e   :  { %1018 = vmatprep.subr.bf16.mxu0 %v1017_v39  ;;  %1034 = vmatprep.subr.bf16.mxu1 %v1033_v41 }
  0x9f   :  { %1020 = vmatpush1.bf16.msra.mxu0 %v1019_v40  ;;  %1036 = vmatpush1.bf16.msra.mxu1 %v1035_v42 }
  0xa0   :  { %v191_v43 = vpop.permute.xlu1 %190  ;;  %v189_v44 = vpop.permute.xlu0 %188 }
  0xa1   :  { %v194_v47 = vsel %vm192_vm5, %v187_v37, %v191_v43  ;;  %v196_v48 = vsel %vm192_vm5, %v191_v43, %v187_v37  ;;  %v193_v49 = vsel %vm192_vm5, %v185_v38, %v189_v44  ;;  %v195_v50 = vsel %vm192_vm5, %v189_v44, %v185_v38 }
  0xa2   :  { %v212_v53 = vmul.f32 %v203_v1, %v194_v47  ;;  %v213_v54 = vmul.f32 %v207_v2, %v196_v48  ;;  %v210_v55 = vmul.f32 %v203_v1, %v193_v49  ;;  %v211_v56 = vmul.f32 %v207_v2, %v195_v50 }
  0xa3   :  { %v1122_v43 = vmov 0  }
  0xa4   :  { %v217_v3 = vpop.permute.xlu1 %216  ;;  %v215_v46 = vpop.permute.xlu0 %214  ;;  %1083 = vset.pattern.permute.xlu1 %v1122_v43  ;;  %1084 = vset.pattern.permute.xlu0 %v1122_v43 }
  0xa8   :  { %v221_v57 = vpop.permute.xlu1 %220  ;;  %v219_v58 = vpop.permute.xlu0 %218 }
  0xa9   :  { %v224_v59 = vsel %vm222_vm6, %v217_v3, %v221_v57  ;;  %v226_v60 = vsel %vm222_vm6, %v221_v57, %v217_v3  ;;  %v223_v61 = vsel %vm222_vm6, %v215_v46, %v219_v58  ;;  %v225_v62 = vsel %vm222_vm6, %v219_v58, %v215_v46  ;;  %v454_v58 = vld [vmem:[%s1640_s4] sm:$0xff] }
  0xaa   :  { %v242_v63 = vmul.f32 %v233_v51, %v224_v59  ;;  %v243_v5 = vmul.f32 %v237_v52, %v226_v60  ;;  %v240_v6 = vmul.f32 %v233_v51, %v223_v61  ;;  %v241_v7 = vmul.f32 %v237_v52, %v225_v62 }
  0xac   :  { %v245_v12 = vpop.permute.xlu0 %244  ;;  %v247_v13 = vpop.permute.xlu1 %246  ;;  %v1021_v14 = vpack.c.bf16 %v241_v7, %v211_v56  ;;  %v1037_v15 = vpack.c.bf16 %v243_v5, %v213_v54  ;;  %v1023_v16 = vpack.c.bf16 %v240_v6, %v210_v55  ;;  %v1039_v17 = vpack.c.bf16 %v242_v63, %v212_v53  ;;  %v451_v55 = vld [vmem:[%s1639_s3] sm:$0xff] }
  0xae   :  { %1022 = vmatprep.subr.bf16.mxu0 %v1021_v14  ;;  %1038 = vmatprep.subr.bf16.mxu1 %v1037_v15 }
  0xaf   :  { %1024 = vmatpush1.bf16.msra.mxu0 %v1023_v16  ;;  %1040 = vmatpush1.bf16.msra.mxu1 %v1039_v17 }
  0xb0   :  { %v249_v20 = vpop.permute.xlu0 %248  ;;  %v251_v21 = vpop.permute.xlu1 %250 }
  0xb1   :  { %v253_v22 = vsel %vm252_vm7, %v245_v12, %v249_v20  ;;  %v255_v23 = vsel %vm252_vm7, %v249_v20, %v245_v12  ;;  %v254_v24 = vsel %vm252_vm7, %v247_v13, %v251_v21  ;;  %v256_v25 = vsel %vm252_vm7, %v251_v21, %v247_v13 }
  0xb2   :  { %v270_v26 = vmul.f32 %v263_v18, %v253_v22  ;;  %v271_v27 = vmul.f32 %v267_v19, %v255_v23  ;;  %v272_v28 = vmul.f32 %v263_v18, %v254_v24  ;;  %v273_v29 = vmul.f32 %v267_v19, %v256_v25 }
  0xb4   :  { %295 = vmatprep.subr.mxu0 %v271_v27  ;;  %366 = vmatprep.subr.mxu1 %v273_v29 }
  0xb5   :  { %296 = vmatpush1.msra.mxu0 %v270_v26  ;;  %367 = vmatpush1.msra.mxu1 %v272_v28 }
  0xb6   :  { %990 = vmatmul.mubr.msk.f32.vlgmr.msra.gmra.mrb[0].mxu0 %vm275_vm8, %v274_v30  ;;  %991 = vmatmul.mubr.msk.f32.vlgmr.msra.gmra.mrb[0].mxu1 %vm275_vm8, %v274_v30 }
  0xb7   :  { %803 = vmatprep.mubr.f32.mxu0 %v1120_v4  ;;  %874 = vmatprep.mubr.f32.mxu1 %v1120_v4 }
 0x189   :  { %v345_v31 = vpop.f32.mrb[0].mxu0  ;;  %v416_v32 = vpop.f32.mrb[0].mxu1 }
 0x18a   :  { %v347_v33 = vpop.f32.mrb[1].mxu0  ;;  %v418_v34 = vpop.f32.mrb[1].mxu1  ;;  %v429_v35 = vmul.f32 %v345_v31, %v345_v31  ;;  %v431_v36 = vmul.f32 %v416_v32, %v416_v32 }
 0x18b   :  { %v421_v37 = vadd.f32 %v347_v33, %v345_v31  ;;  %v430_v38 = vmul.f32 %v347_v33, %v347_v33  ;;  %v424_v39 = vadd.f32 %v418_v34, %v416_v32  ;;  %v432_v40 = vmul.f32 %v418_v34, %v418_v34 }
 0x18d   :  { %422 = vadd.xlane.f32.xlu0 %v421_v37  ;;  %v433_v41 = vadd.f32 %v430_v38, %v429_v35  ;;  %425 = vadd.xlane.f32.xlu1 %v424_v39  ;;  %v436_v42 = vadd.f32 %v432_v40, %v431_v36 }
 0x191   :  { %434 = vadd.xlane.f32.xlu0 %v433_v41 }
 0x195   :  { %437 = vadd.xlane.f32.xlu0 %v436_v42 }
 0x21a   :  { %v423_v4 = vpop.xlane.xlu0 %422  ;;  %v426_v44 = vpop.xlane.xlu1 %425 }
 0x21b   :  { %v427_v45 = vmul.f32 0.00390625, %v423_v4  ;;  %v428_v0 = vmul.f32 0.00390625, %v426_v44 }
 0x21d   :  { %v441_v2 = vmul.f32 %v427_v45, %v427_v45  ;;  %v442_v47 = vmul.f32 %v428_v0, %v428_v0 }
 0x21e   :  { %v435_v1 = vpop.xlane.xlu0 %434 }
 0x21f   :  { %v439_v3 = vmul.f32 0.00390625, %v435_v1  ;;  %v996_v1 = vld [vmem:[%s1637_s1 + $0x2] sm:$0x3] }
 0x221   :  { %v443_v46 = vsub.f32 %v439_v3, %v441_v2  ;;  %v998_v3 = vld [vmem:[%s1637_s1 + $0x6] sm:$0x3] }
 0x222   :  { %v438_v48 = vpop.xlane.xlu0 %437 }
 0x223   :  { %v445_v49 = vmax.f32 %v443_v46, 0.0  ;;  %v440_v50 = vmul.f32 0.00390625, %v438_v48  ;;  %v997_v46 = vld [vmem:[%s1637_s1 + $0x4] sm:$0x3] }
 0x225   :  { %v447_v51 = vadd.f32 1e-06, %v445_v49  ;;  %v444_v52 = vsub.f32 %v440_v50, %v442_v47 }
 0x227   :  { %1085 = vrsqrt.f32 %v447_v51  ;;  %v446_v53 = vmax.f32 %v444_v52, 0.0  ;;  %v556_v52 = vrot.slane %v996_v1, %v1256_v10 }
 0x229   :  { %v448_v54 = vadd.f32 1e-06, %v446_v53  ;;  %v560_v53 = vrot.slane %v996_v1, %v1258_v11 }
 0x22b   :  { %1087 = vrsqrt.f32 %v448_v54  ;;  %v1482_v54 = vrot.slane %v998_v3, %v1258_v11 }
 0x231   :  { %v1086_v56 = vpop.eup %1085 }
 0x232   :  { %v452_v57 = vmul.f32 %v1086_v56, %v451_v55 }
 0x234   :  { %461 = vperm.xlu1 %1083, %v452_v57   ;;  %v455_v59 = vmul.f32 %v452_v57, %v427_v45  ;;  %v1490_v57 = vrot.slane %v998_v3, %v1256_v10 }
 0x235   :  { %v1088_v60 = vpop.eup %1087 }
 0x236   :  { %v457_v61 = vsub.f32 %v454_v58, %v455_v59  ;;  %v453_v62 = vmul.f32 %v1088_v60, %v451_v55  ;;  %v1485_v55 = vrot.slane %v997_v46, %v1258_v11 }
 0x238   :  { %475 = vperm.xlu1 %1083, %v457_v61   ;;  %466 = vperm.xlu0 %1084, %v453_v62   ;;  %v456_v63 = vmul.f32 %v453_v62, %v428_v0  ;;  %v523_v0 = vld [vmem:[%s1637_s1] sm:$0x3] }
 0x239   :  { %v528_v47 = vrot.slane %v523_v0, %v1256_v10  ;;  %v532_v48 = vrot.slane %v523_v0, %v1258_v11 }
 0x23a   :  { %v458_v5 = vsub.f32 %v454_v58, %v456_v63 }
 0x23c   :  { %480 = vperm.xlu1 %1083, %v458_v5  }
 0x2b3   :  { %v462_v6 = vpop.permute.xlu1 %461 }
 0x2b4   :  { %v469_v7 = vmul.f32 %v462_v6, %v345_v31  ;;  %v470_v8 = vmul.f32 %v462_v6, %v347_v33 }
 0x2b7   :  { %v476_v12 = vpop.permute.xlu1 %475  ;;  %v467_v13 = vpop.permute.xlu0 %466 }
 0x2b8   :  { %v483_v14 = vadd.f32 %v476_v12, %v469_v7  ;;  %v484_v15 = vadd.f32 %v476_v12, %v470_v8  ;;  %v471_v18 = vmul.f32 %v467_v13, %v416_v32  ;;  %v472_v19 = vmul.f32 %v467_v13, %v418_v34 }
 0x2b9   :  { %v584_v12 = vrot.slane %v997_v46, %v1256_v10 }
 0x2ba   :  { %v491_v16 = vmin.f32 %v483_v14, 0.0  ;;  %v492_v17 = vmin.f32 %v484_v15, 0.0  ;;  %vm487_vm9 = vcmp.gt.f32.partialorder %v483_v14, 0.0  ;;  %vm488_vm10 = vcmp.gt.f32.partialorder %v484_v15, 0.0 }
 0x2bb   :  { %v481_v20 = vpop.permute.xlu1 %480 }
 0x2bc   :  { %v495_v21 = vmul.f32 1.442695, %v491_v16  ;;  %v497_v22 = vmul.f32 1.442695, %v492_v17  ;;  %v485_v23 = vadd.f32 %v481_v20, %v471_v18  ;;  %v486_v24 = vadd.f32 %v481_v20, %v472_v19  ;;  %v999_v19 = vld [vmem:[%s1637_s1 + $0x8] sm:$0x3] }
 0x2be   :  { %1089 = vpow2.f32 %v495_v21  ;;  %v493_v25 = vmin.f32 %v485_v23, 0.0  ;;  %v494_v26 = vmin.f32 %v486_v24, 0.0  ;;  %vm489_vm11 = vcmp.gt.f32.partialorder %v485_v23, 0.0 }
 0x2bf   :  { %1091 = vpow2.f32 %v497_v22  ;;  %vm490_vm12 = vcmp.gt.f32.partialorder %v486_v24, 0.0 }
 0x2c0   :  { %v499_v27 = vmul.f32 1.442695, %v493_v25  ;;  %v501_v28 = vmul.f32 1.442695, %v494_v26  ;;  %v1514_v26 = vrot.slane %v999_v19, %v1256_v10 }
 0x2c2   :  { %1093 = vpow2.f32 %v499_v27  ;;  %v1517_v27 = vrot.slane %v999_v19, %v1258_v11 }
 0x2c3   :  { %1095 = vpow2.f32 %v501_v28 }
 0x2c8   :  { %v1090_v29 = vpop.eup %1089 }
 0x2c9   :  { %v1092_v30 = vpop.eup %1091  ;;  %v992_v31 = vadd.f32 -1.0, %v1090_v29 }
 0x2ca   :  { %v993_v33 = vadd.f32 -1.0, %v1092_v30 }
 0x2cb   :  { %v1389_v32 = vsel %vm487_vm9, %v483_v14, %v992_v31 }
 0x2cc   :  { %v1094_v34 = vpop.eup %1093  ;;  %v1391_v35 = vsel %vm488_vm10, %v484_v15, %v993_v33  ;;  %511 = vrot.lane.b32.xlu1 %v1389_v32, %s1113_s9 }
 0x2cd   :  { %v994_v36 = vadd.f32 -1.0, %v1094_v34  ;;  %543 = vrot.lane.b32.xlu0 %v1391_v35, %s1114_s14  ;;  %v1096_v38 = vpop.eup %1095 }
 0x2ce   :  { %v995_v39 = vadd.f32 -1.0, %v1096_v38 }
 0x2cf   :  { %v1397_v37 = vsel %vm489_vm11, %v485_v23, %v994_v36 }
 0x2d0   :  { %513 = vrot.lane.b32.xlu1 %v1397_v37, %s1113_s9  ;;  %v1407_v40 = vsel %vm490_vm12, %v486_v24, %v995_v39 }
 0x2d1   :  { %567 = vrot.lane.b32.xlu0 %v1389_v32, %s1115_s15 }
 0x2d4   :  { %515 = vrot.lane.b32.xlu1 %v1391_v35, %s1113_s9 }
 0x2d5   :  { %571 = vrot.lane.b32.xlu0 %v1391_v35, %s1115_s15 }
 0x2d8   :  { %517 = vrot.lane.b32.xlu1 %v1407_v40, %s1113_s9 }
 0x2d9   :  { %595 = vrot.lane.b32.xlu0 %v1389_v32, %s1116_s16 }
 0x2dc   :  { %539 = vrot.lane.b32.xlu1 %v1389_v32, %s1114_s14 }
 0x2dd   :  { %599 = vrot.lane.b32.xlu0 %v1391_v35, %s1116_s16 }
 0x2e0   :  { %541 = vrot.lane.b32.xlu1 %v1397_v37, %s1114_s14 }
 0x2e1   :  { %623 = vrot.lane.b32.xlu0 %v1389_v32, %s1117_s17 }
 0x2e4   :  { %545 = vrot.lane.b32.xlu1 %v1407_v40, %s1114_s14 }
 0x2e5   :  { %627 = vrot.lane.b32.xlu0 %v1391_v35, %s1117_s17 }
 0x2e8   :  { %569 = vrot.lane.b32.xlu1 %v1397_v37, %s1115_s15 }
 0x2e9   :  { %651 = vrot.lane.b32.xlu0 %v1389_v32, %s1118_s18 }
 0x2ec   :  { %573 = vrot.lane.b32.xlu1 %v1407_v40, %s1115_s15 }
 0x2ed   :  { %655 = vrot.lane.b32.xlu0 %v1391_v35, %s1118_s18 }
 0x2f0   :  { %597 = vrot.lane.b32.xlu1 %v1397_v37, %s1116_s16 }
 0x2f1   :  { %679 = vrot.lane.b32.xlu0 %v1389_v32, %s1119_s19 }
 0x2f4   :  { %601 = vrot.lane.b32.xlu1 %v1407_v40, %s1116_s16 }
 0x2f5   :  { %683 = vrot.lane.b32.xlu0 %v1391_v35, %s1119_s19 }
 0x2f8   :  { %625 = vrot.lane.b32.xlu1 %v1397_v37, %s1117_s17 }
 0x2f9   :  { %707 = vrot.lane.b32.xlu0 %v1389_v32, %s1121_s20 }
 0x2fc   :  { %629 = vrot.lane.b32.xlu1 %v1407_v40, %s1117_s17 }
 0x2fd   :  { %711 = vrot.lane.b32.xlu0 %v1391_v35, %s1121_s20 }
 0x300   :  { %653 = vrot.lane.b32.xlu1 %v1397_v37, %s1118_s18 }
 0x304   :  { %657 = vrot.lane.b32.xlu1 %v1407_v40, %s1118_s18 }
 0x308   :  { %681 = vrot.lane.b32.xlu1 %v1397_v37, %s1119_s19 }
 0x30c   :  { %685 = vrot.lane.b32.xlu1 %v1407_v40, %s1119_s19 }
 0x310   :  { %709 = vrot.lane.b32.xlu1 %v1397_v37, %s1121_s20 }
 0x314   :  { %713 = vrot.lane.b32.xlu1 %v1407_v40, %s1121_s20 }
 0x33e   :  { %v512_v41 = vpop.permute.xlu1 %511 }
 0x33f   :  { %v544_v42 = vpop.permute.xlu0 %543 }
 0x342   :  { %v514_v43 = vpop.permute.xlu1 %513 }
 0x343   :  { %v568_v4 = vpop.permute.xlu0 %567 }
 0x346   :  { %v516_v44 = vpop.permute.xlu1 %515 }
 0x347   :  { %v572_v45 = vpop.permute.xlu0 %571  ;;  %v519_v50 = vsel %vm43_vm0, %v512_v41, %v516_v44  ;;  %v521_v51 = vsel %vm43_vm0, %v516_v44, %v512_v41 }
 0x348   :  { %v575_v56 = vsel %vm102_vm2, %v568_v4, %v572_v45  ;;  %v535_v59 = vmul.f32 %v528_v47, %v521_v51  ;;  %v536_v60 = vmul.f32 %v532_v48, %v519_v50  ;;  %v577_v14 = vsel %vm102_vm2, %v572_v45, %v568_v4  ;;  %v1001_v50 = vld [vmem:[%s1637_s1 + $0xc] sm:$0x3] }
 0x349   :  { %v592_v15 = vmul.f32 %v1485_v55, %v575_v56  ;;  %v591_v25 = vmul.f32 %v584_v12, %v577_v14  ;;  %v696_v56 = vrot.slane %v1001_v50, %v1256_v10 }
 0x34a   :  { %v518_v2 = vpop.permute.xlu1 %517 }
 0x34b   :  { %v596_v49 = vpop.permute.xlu0 %595  ;;  %v522_v20 = vsel %vm43_vm0, %v518_v2, %v514_v43  ;;  %v520_v23 = vsel %vm43_vm0, %v514_v43, %v518_v2 }
 0x34c   :  { %v537_v28 = vmul.f32 %v528_v47, %v522_v20  ;;  %v538_v30 = vmul.f32 %v532_v48, %v520_v23  ;;  %v1000_v48 = vld [vmem:[%s1637_s1 + $0xa] sm:$0x3] }
 0x34e   :  { %v540_v58 = vpop.permute.xlu1 %539 }
 0x34f   :  { %v600_v61 = vpop.permute.xlu0 %599  ;;  %v547_v62 = vsel %vm72_vm1, %v540_v58, %v544_v42  ;;  %v549_v63 = vsel %vm72_vm1, %v544_v42, %v540_v58  ;;  %v700_v58 = vrot.slane %v1001_v50, %v1258_v11 }
 0x350   :  { %v603_v5 = vsel %vm132_vm3, %v596_v49, %v600_v61  ;;  %v605_v6 = vsel %vm132_vm3, %v600_v61, %v596_v49  ;;  %v563_v7 = vmul.f32 %v556_v52, %v549_v63  ;;  %v564_v8 = vmul.f32 %v560_v53, %v547_v62 }
 0x351   :  { %v620_v13 = vmul.f32 %v1482_v54, %v603_v5  ;;  %v619_v21 = vmul.f32 %v1490_v57, %v605_v6 }
 0x352   :  { %v1043_v16 = vpack.c.bf16 %v563_v7, %v535_v59  ;;  %v542_v17 = vpop.permute.xlu1 %541  ;;  %v1041_v18 = vpack.c.bf16 %v564_v8, %v536_v60 }
 0x353   :  { %v624_v22 = vpop.permute.xlu0 %623  ;;  %v1045_v24 = vpack.c.bf16 %v620_v13, %v592_v15  ;;  %v1047_v31 = vpack.c.bf16 %v619_v21, %v591_v25  ;;  %v1002_v21 = vld [vmem:[%s1637_s1 + $0xe] sm:$0x3] }
 0x354   :  { %1042 = vmatprep.subr.bf16.mxu0 %v1041_v18 }
 0x355   :  { %1044 = vmatpush1.bf16.msra.mxu0 %v1043_v16 }
 0x356   :  { %1046 = vmatprep.subr.bf16.mxu0 %v1045_v24  ;;  %v546_v29 = vpop.permute.xlu1 %545 }
 0x357   :  { %v628_v33 = vpop.permute.xlu0 %627  ;;  %v548_v34 = vsel %vm72_vm1, %v542_v17, %v546_v29  ;;  %v550_v36 = vsel %vm72_vm1, %v546_v29, %v542_v17 }
 0x358   :  { %v631_v38 = vsel %vm162_vm4, %v624_v22, %v628_v33  ;;  %v633_v39 = vsel %vm162_vm4, %v628_v33, %v624_v22  ;;  %v565_v41 = vmul.f32 %v556_v52, %v550_v36  ;;  %v566_v42 = vmul.f32 %v560_v53, %v548_v34 }
 0x359   :  { %v647_v43 = vmul.f32 %v1514_v26, %v631_v38  ;;  %v648_v4 = vmul.f32 %v1517_v27, %v633_v39  ;;  %1048 = vmatpush1.bf16.msra.mxu0 %v1047_v31  ;;  %v668_v52 = vrot.slane %v1000_v48, %v1256_v10  ;;  %v672_v53 = vrot.slane %v1000_v48, %v1258_v11 }
 0x35a   :  { %v1059_v44 = vpack.c.bf16 %v565_v41, %v537_v28  ;;  %v570_v45 = vpop.permute.xlu1 %569  ;;  %v1057_v0 = vpack.c.bf16 %v566_v42, %v538_v30  ;;  %v735_v41 = vld [vmem:[%s1641_s5] sm:$0xff] }
 0x35b   :  { %v1051_v1 = vpack.c.bf16 %v647_v43, %v1389_v32  ;;  %v652_v2 = vpop.permute.xlu0 %651  ;;  %v1049_v3 = vpack.c.bf16 %v648_v4, %v1391_v35 }
 0x35c   :  { %1058 = vmatprep.subr.bf16.mxu1 %v1057_v0 }
 0x35d   :  { %1050 = vmatprep.subr.bf16.mxu0 %v1049_v3  ;;  %1060 = vmatpush1.bf16.msra.mxu1 %v1059_v44 }
 0x35e   :  { %1052 = vmatpush1.bf16.msra.mxu0 %v1051_v1  ;;  %v574_v46 = vpop.permute.xlu1 %573 }
 0x35f   :  { %v656_v47 = vpop.permute.xlu0 %655  ;;  %v576_v32 = vsel %vm102_vm2, %v570_v45, %v574_v46  ;;  %v578_v35 = vsel %vm102_vm2, %v574_v46, %v570_v45 }
 0x360   :  { %v659_v59 = vsel %vm192_vm5, %v652_v2, %v656_v47  ;;  %v661_v60 = vsel %vm192_vm5, %v656_v47, %v652_v2  ;;  %v593_v62 = vmul.f32 %v584_v12, %v578_v35  ;;  %v594_v63 = vmul.f32 %v1485_v55, %v576_v32 }
 0x361   :  { %v675_v12 = vmul.f32 %v668_v52, %v659_v59  ;;  %v676_v16 = vmul.f32 %v672_v53, %v661_v60 }
 0x362   :  { %v598_v49 = vpop.permute.xlu1 %597 }
 0x363   :  { %v680_v51 = vpop.permute.xlu0 %679 }
 0x366   :  { %v602_v61 = vpop.permute.xlu1 %601 }
 0x367   :  { %v684_v5 = vpop.permute.xlu0 %683  ;;  %v604_v6 = vsel %vm132_vm3, %v598_v49, %v602_v61  ;;  %v606_v7 = vsel %vm132_vm3, %v602_v61, %v598_v49 }
 0x368   :  { %v687_v8 = vsel %vm222_vm6, %v680_v51, %v684_v5  ;;  %v689_v13 = vsel %vm222_vm6, %v684_v5, %v680_v51  ;;  %v621_v14 = vmul.f32 %v1490_v57, %v606_v7  ;;  %v622_v15 = vmul.f32 %v1482_v54, %v604_v6 }
 0x369   :  { %v703_v55 = vmul.f32 %v696_v56, %v687_v8  ;;  %v704_v17 = vmul.f32 %v700_v58, %v689_v13  ;;  %v724_v57 = vrot.slane %v1002_v21, %v1256_v10  ;;  %v728_v54 = vrot.slane %v1002_v21, %v1258_v11 }
 0x36a   :  { %v1063_v18 = vpack.c.bf16 %v621_v14, %v593_v62  ;;  %v626_v19 = vpop.permute.xlu1 %625  ;;  %v1061_v20 = vpack.c.bf16 %v622_v15, %v594_v63 }
 0x36b   :  { %v1055_v22 = vpack.c.bf16 %v703_v55, %v675_v12  ;;  %v708_v23 = vpop.permute.xlu0 %707  ;;  %v1053_v24 = vpack.c.bf16 %v704_v17, %v676_v16  ;;  %v911_v55 = vld [vmem:[%s1642_s6] sm:$0xff] }
 0x36c   :  { %1062 = vmatprep.subr.bf16.mxu1 %v1061_v20 }
 0x36d   :  { %1054 = vmatprep.subr.bf16.mxu0 %v1053_v24  ;;  %1064 = vmatpush1.bf16.msra.mxu1 %v1063_v18 }
 0x36e   :  { %1056 = vmatpush1.bf16.msra.mxu0 %v1055_v22  ;;  %v630_v25 = vpop.permute.xlu1 %629  ;;  %v914_v22 = vld [vmem:[%s1643_s7] sm:$0xff] }
 0x36f   :  { %v712_v28 = vpop.permute.xlu0 %711  ;;  %v632_v29 = vsel %vm162_vm4, %v626_v19, %v630_v25  ;;  %v634_v30 = vsel %vm162_vm4, %v630_v25, %v626_v19 }
 0x370   :  { %v715_v31 = vsel %vm252_vm7, %v708_v23, %v712_v28  ;;  %v717_v33 = vsel %vm252_vm7, %v712_v28, %v708_v23  ;;  %v649_v34 = vmul.f32 %v1514_v26, %v632_v29  ;;  %v650_v10 = vmul.f32 %v1517_v27, %v634_v30 }
 0x371   :  { %v731_v11 = vmul.f32 %v724_v57, %v715_v31  ;;  %v732_v36 = vmul.f32 %v728_v54, %v717_v33 }
 0x372   :  { %v1067_v38 = vpack.c.bf16 %v649_v34, %v1397_v37  ;;  %v654_v39 = vpop.permute.xlu1 %653  ;;  %v1065_v42 = vpack.c.bf16 %v650_v10, %v1407_v40 }
 0x373   :  { %755 = vmatprep.subr.mxu0 %v732_v36 }
 0x374   :  { %756 = vmatpush1.msra.mxu0 %v731_v11  ;;  %1066 = vmatprep.subr.bf16.mxu1 %v1065_v42  ;;  %v1109_v42 = vld [vmem:[%s1636_s0] sm:$0xff] }
 0x375   :  { %1003 = vmatmul.mubr.msk.f32.vlgmr.msra.gmra.mrb[2].mxu0 %vm275_vm8, %v735_v41  ;;  %1068 = vmatpush1.bf16.msra.mxu1 %v1067_v38 }
 0x376   :  { %v658_v26 = vpop.permute.xlu1 %657 }
 0x377   :  { %v660_v27 = vsel %vm192_vm5, %v654_v39, %v658_v26  ;;  %v662_v37 = vsel %vm192_vm5, %v658_v26, %v654_v39 }
 0x378   :  { %v677_v45 = vmul.f32 %v668_v52, %v660_v27  ;;  %v678_v0 = vmul.f32 %v672_v53, %v662_v37 }
 0x37a   :  { %v682_v43 = vpop.permute.xlu1 %681 }
 0x37e   :  { %v686_v4 = vpop.permute.xlu1 %685 }
 0x37f   :  { %v688_v44 = vsel %vm222_vm6, %v682_v43, %v686_v4  ;;  %v690_v40 = vsel %vm222_vm6, %v686_v4, %v682_v43  ;;  %v1110_v43 = vld [vmem:[%s1636_s0 + $0x8] sm:$0xff] }
 0x380   :  { %v705_v1 = vmul.f32 %v696_v56, %v688_v44  ;;  %v706_v2 = vmul.f32 %v700_v58, %v690_v40 }
 0x382   :  { %v1071_v3 = vpack.c.bf16 %v705_v1, %v677_v45  ;;  %v710_v46 = vpop.permute.xlu1 %709  ;;  %v1069_v47 = vpack.c.bf16 %v706_v2, %v678_v0 }
 0x384   :  { %1070 = vmatprep.subr.bf16.mxu1 %v1069_v47 }
 0x385   :  { %1072 = vmatpush1.bf16.msra.mxu1 %v1071_v3 }
 0x386   :  { %v714_v48 = vpop.permute.xlu1 %713 }
 0x387   :  { %v716_v49 = vsel %vm252_vm7, %v710_v46, %v714_v48  ;;  %v718_v50 = vsel %vm252_vm7, %v714_v48, %v710_v46 }
 0x388   :  { %v733_v51 = vmul.f32 %v724_v57, %v716_v49  ;;  %v734_v32 = vmul.f32 %v728_v54, %v718_v50 }
 0x38a   :  { %826 = vmatprep.subr.mxu1 %v734_v32 }
 0x38b   :  { %827 = vmatpush1.msra.mxu1 %v733_v51 }
 0x38c   :  { %1004 = vmatmul.mubr.msk.f32.vlgmr.msra.gmra.mrb[2].mxu1 %vm275_vm8, %v735_v41 }
 0x448   :  { %v805_v35 = vpop.f32.mrb[2].mxu0 }
 0x449   :  { %v807_v52 = vpop.f32.mrb[3].mxu0  ;;  %v889_v53 = vmul.f32 %v805_v35, %v805_v35 }
 0x44a   :  { %v890_v56 = vmul.f32 %v807_v52, %v807_v52  ;;  %v881_v58 = vadd.f32 %v807_v52, %v805_v35 }
 0x44c   :  { %882 = vadd.xlane.f32.xlu0 %v881_v58  ;;  %v893_v59 = vadd.f32 %v890_v56, %v889_v53  ;;  %v1112_v53 = vld [vmem:[%s1636_s0 + $0x18] sm:$0xff] }
 0x450   :  { %894 = vadd.xlane.f32.xlu0 %v893_v59 }
 0x45f   :  { %v1594_v60 = vpop.f32.mrb[2].mxu1 }
 0x460   :  { %v1596_v61 = vpop.f32.mrb[3].mxu1  ;;  %v891_v9 = vmul.f32 %v1594_v60, %v1594_v60 }
 0x461   :  { %v892_v62 = vmul.f32 %v1596_v61, %v1596_v61  ;;  %v884_v63 = vadd.f32 %v1596_v61, %v1594_v60 }
 0x463   :  { %885 = vadd.xlane.f32.xlu1 %v884_v63  ;;  %v896_v5 = vadd.f32 %v892_v62, %v891_v9 }
 0x465   :  { %897 = vadd.xlane.f32.xlu0 %v896_v5 }
 0x4d9   :  { %v883_v6 = vpop.xlane.xlu0 %882 }
 0x4da   :  { %v887_v7 = vmul.f32 0.00390625, %v883_v6 }
 0x4dc   :  { %v901_v8 = vmul.f32 %v887_v7, %v887_v7 }
 0x4dd   :  { %v895_v13 = vpop.xlane.xlu0 %894 }
 0x4de   :  { %v899_v14 = vmul.f32 0.00390625, %v895_v13 }
 0x4e0   :  { %v903_v15 = vsub.f32 %v899_v14, %v901_v8 }
 0x4e2   :  { %v905_v12 = vmax.f32 %v903_v15, 0.0 }
 0x4e4   :  { %v907_v16 = vadd.f32 1e-06, %v905_v12 }
 0x4e6   :  { %1097 = vrsqrt.f32 %v907_v16 }
 0x4f0   :  { %v1098_v17 = vpop.eup %1097  ;;  %v886_v18 = vpop.xlane.xlu1 %885 }
 0x4f1   :  { %v888_v19 = vmul.f32 0.00390625, %v886_v18  ;;  %v912_v20 = vmul.f32 %v1098_v17, %v911_v55 }
 0x4f2   :  { %v898_v21 = vpop.xlane.xlu0 %897 }
 0x4f3   :  { %v902_v23 = vmul.f32 %v888_v19, %v888_v19  ;;  %v900_v24 = vmul.f32 0.00390625, %v898_v21  ;;  %921 = vperm.xlu1 %1083, %v912_v20   ;;  %v915_v57 = vmul.f32 %v912_v20, %v887_v7 }
 0x4f5   :  { %v904_v54 = vsub.f32 %v900_v24, %v902_v23  ;;  %v917_v25 = vsub.f32 %v914_v22, %v915_v57 }
 0x4f7   :  { %v906_v28 = vmax.f32 %v904_v54, 0.0  ;;  %935 = vperm.xlu1 %1083, %v917_v25  }
 0x4f9   :  { %v908_v29 = vadd.f32 1e-06, %v906_v28 }
 0x4fb   :  { %1099 = vrsqrt.f32 %v908_v29 }
 0x505   :  { %v1100_v30 = vpop.eup %1099 }
 0x506   :  { %v913_v31 = vmul.f32 %v1100_v30, %v911_v55 }
 0x508   :  { %926 = vperm.xlu0 %1084, %v913_v31   ;;  %v916_v33 = vmul.f32 %v913_v31, %v888_v19 }
 0x50a   :  { %v918_v34 = vsub.f32 %v914_v22, %v916_v33 }
 0x50c   :  { %940 = vperm.xlu1 %1083, %v918_v34  }
 0x572   :  { %v922_v10 = vpop.permute.xlu1 %921 }
 0x573   :  { %v929_v11 = vmul.f32 %v922_v10, %v805_v35  ;;  %v930_v36 = vmul.f32 %v922_v10, %v807_v52  ;;  %v1111_v35 = vld [vmem:[%s1636_s0 + $0x10] sm:$0xff] }
 0x576   :  { %v936_v38 = vpop.permute.xlu1 %935 }
 0x577   :  { %v943_v39 = vadd.f32 %v936_v38, %v929_v11  ;;  %v944_v41 = vadd.f32 %v936_v38, %v930_v36 }
 0x579   :  { %v947_v26 = vadd.f32 %v1109_v42, %v943_v39  ;;  %v948_v27 = vadd.f32 %v1110_v43, %v944_v41 }
 0x57b   :  { %v955_v37 = vmin.f32 %v947_v26, 0.0  ;;  %v956_v4 = vmin.f32 %v948_v27, 0.0  ;;  %vm951_vm13 = vcmp.gt.f32.partialorder %v947_v26, 0.0  ;;  %vm952_vm14 = vcmp.gt.f32.partialorder %v948_v27, 0.0 }
 0x57d   :  { %v959_v44 = vmul.f32 1.442695, %v955_v37  ;;  %v961_v40 = vmul.f32 1.442695, %v956_v4 }
 0x57f   :  { %1101 = vpow2.f32 %v959_v44 }
 0x580   :  { %1103 = vpow2.f32 %v961_v40 }
 0x587   :  { %v927_v45 = vpop.permute.xlu0 %926 }
 0x588   :  { %v931_v3 = vmul.f32 %v927_v45, %v1594_v60  ;;  %v932_v46 = vmul.f32 %v927_v45, %v1596_v61 }
 0x589   :  { %v1102_v0 = vpop.eup %1101 }
 0x58a   :  { %v1104_v1 = vpop.eup %1103  ;;  %v1005_v2 = vadd.f32 -1.0, %v1102_v0 }
 0x58b   :  { %v1006_v47 = vadd.f32 -1.0, %v1104_v1  ;;  %v941_v48 = vpop.permute.xlu1 %940 }
 0x58c   :  { %v971_v49 = vsel %vm951_vm13, %v947_v26, %v1005_v2  ;;  %v945_v50 = vadd.f32 %v941_v48, %v931_v3  ;;  %v946_v51 = vadd.f32 %v941_v48, %v932_v46 }
 0x58d   :  { %v972_v32 = vsel %vm952_vm14, %v948_v27, %v1006_v47  ;;  %975 = vst [vmem:[%s1644_s8] sm:$0xff] %v971_v49 }
 0x58e   :  { %976 = vst [vmem:[%s1644_s8 + $0x8] sm:$0xff] %v972_v32  ;;  %v949_v52 = vadd.f32 %v1111_v35, %v945_v50  ;;  %v950_v56 = vadd.f32 %v1112_v53, %v946_v51 }
 0x590   :  { %v957_v58 = vmin.f32 %v949_v52, 0.0  ;;  %v958_v59 = vmin.f32 %v950_v56, 0.0  ;;  %vm953_vm15 = vcmp.gt.f32.partialorder %v949_v52, 0.0  ;;  %vm954_vm0 = vcmp.gt.f32.partialorder %v950_v56, 0.0 }
 0x592   :  { %v963_v60 = vmul.f32 1.442695, %v957_v58  ;;  %v965_v61 = vmul.f32 1.442695, %v958_v59 }
 0x594   :  { %1105 = vpow2.f32 %v963_v60 }
 0x595   :  { %1107 = vpow2.f32 %v965_v61 }
 0x59e   :  { %v1106_v9 = vpop.eup %1105 }
 0x59f   :  { %v1108_v62 = vpop.eup %1107  ;;  %v1007_v63 = vadd.f32 -1.0, %v1106_v9 }
 0x5a0   :  { %v1008_v5 = vadd.f32 -1.0, %v1108_v62 }
 0x5a1   :  { %v973_v6 = vsel %vm953_vm15, %v949_v52, %v1007_v63 }
 0x5a2   :  { %v974_v7 = vsel %vm954_vm0, %v950_v56, %v1008_v5  ;;  %977 = vst [vmem:[%s1644_s8 + $0x10] sm:$0xff] %v973_v6 }
 0x5a3   :  { %978 = vst [vmem:[%s1644_s8 + $0x18] sm:$0xff] %v974_v7 }

</bundles_post_ra>
